<compile_context>
chip_gen: v5e
topology: v5e:2x2
jax: 0.10.0
libtpu: 0.0.40
codegen_flags: <defaults>
</compile_context>

<pallas_src>
import jax
import jax.numpy as jnp
import numpy as np
from jax.experimental import pallas as pl
from jax.experimental.pallas import tpu as pltpu


def _make_kernel(use_mxu):
    def householder_conv_kernel(v_ref, u_ref, x_ref, o_ref):
        # v_ref: (C, 1) f32  -- reflection vector (column)
        # u_ref: (C, 1) f32  -- 2 * v / (v . v), pre-scaled in the wrapper
        # x_ref: (b_blk, C, t_hw) native dtype, lane-dense tile
        x = x_ref[...]
        if use_mxu:
            # (C,1) x (b,C,t) -> (b,1,t) skinny MXU matmul, f32 accumulation.
            # x stays in its native dtype (bf16 goes straight to the MXU).
            s = jnp.einsum("cz,bct->bzt", v_ref[...].astype(x.dtype), x,
                           preferred_element_type=jnp.float32)
        else:
            # Tiny C: VPU multiply + XLU cross-sublane reduce beats an MXU
            # push/pop for a (1,C)x(C,t) matmul that uses <1% of the array.
            s = jnp.sum(v_ref[...][None] * x, axis=1, keepdims=True)  # (b,1,t) f32
        # Rank-1 update: y = x - u * s   (broadcast (1,C,1) * (b,1,t)).
        y = x - u_ref[...][None] * s
        o_ref[...] = y.astype(o_ref.dtype)
    return householder_conv_kernel


def _choose_tiles(n, channels, hw, itemsize):
    """Pick (b_blk, t_hw): lane-dense tiles sized in bytes (~2 MiB per slab,
    sublane padding included) and batch packing for small feature maps, while
    keeping >= 2 grid steps when possible (v7x megacore)."""
    target = 2 * 1024 * 1024                       # ~2 MiB per buffered slab
    sub = 32 // itemsize                           # sublane pack: 8 f32 / 16 bf16 / 32 i8
    c_pad = pl.cdiv(channels, sub) * sub           # real VMEM rows after padding
    per_lane_bytes = c_pad * itemsize

    hw_lane = pl.cdiv(hw, 128) * 128               # lane-dense extent of HW
    max_lanes = max(128, (target // per_lane_bytes) // 128 * 128)
    if hw_lane <= max_lanes:
        t_hw = hw_lane                             # single full-width tile, no ragged tail
    else:
        t_hw = max_lanes
        # Prefer a multiple-of-128 tile that divides HW exactly (no ragged
        # last tile) as long as it stays reasonably large.
        if hw % 128 == 0:
            for cand in range(max_lanes, max_lanes // 2 - 1, -128):
                if cand >= 128 and hw % cand == 0:
                    t_hw = cand
                    break
    n_hw_tiles = pl.cdiv(hw, t_hw)

    # Pack batch elements per step when the spatial slab is small.
    slab = c_pad * t_hw * itemsize
    max_b = max(1, min(n, target // max(slab, 1)))
    if n_hw_tiles == 1 and n >= 2:
        max_b = min(max_b, n // 2)                 # keep >= 2 grid steps (v7x: 2 TCs)
    b_blk = 1
    for cand in range(max_b, 0, -1):               # divisor of N -> no ragged batch block
        if n % cand == 0:
            b_blk = cand
            break
    return b_blk, t_hw


def householder_1x1_conv(x, v, log_det_jac, z):
    """Pallas implementation of Housholder1x1Conv.forward.

    x:            (N, C, H, W)  NCHW activations
    v:            (C,)          Householder vector parameter
    log_det_jac:  passed through unchanged (|det w| == 1)
    z:            passed through unchanged
    """
    N, C, H, W = x.shape
    HW = H * W
    itemsize = x.dtype.itemsize
    b_blk, t_hw = _choose_tiles(N, C, HW, itemsize)

    # Free metadata reshape (contiguous); no HBM copy, no padding.
    x_flat = x.reshape(N, C, HW)

    # All v-dependent scalar work hoisted out of the kernel (runs once).
    v_f32 = v.astype(jnp.float32)
    v_col = v_f32.reshape(C, 1)
    u_col = (2.0 * v_f32 / jnp.dot(v_f32, v_f32)).reshape(C, 1)

    grid = (pl.cdiv(N, b_blk), pl.cdiv(HW, t_hw))
    use_mxu = C >= 32

    out_flat = pl.pallas_call(
        _make_kernel(use_mxu),
        out_shape=jax.ShapeDtypeStruct((N, C, HW), x.dtype),
        grid_spec=pltpu.PrefetchScalarGridSpec(
            num_scalar_prefetch=0,
            grid=grid,
            in_specs=[
                # v / u are tiny, constant index_map -> resident in VMEM for
                # the whole grid.
                pl.BlockSpec((C, 1), lambda b, t: (0, 0)),
                pl.BlockSpec((C, 1), lambda b, t: (0, 0)),
                pl.BlockSpec((b_blk, C, t_hw), lambda b, t: (b, 0, t)),
            ],
            out_specs=pl.BlockSpec((b_blk, C, t_hw), lambda b, t: (b, 0, t)),
        ),
        compiler_params=pltpu.CompilerParams(
            dimension_semantics=("parallel", "parallel")),
        cost_estimate=pl.CostEstimate(
            flops=4 * N * C * HW,            # dot (2*C) + rank-1 FMA (2) per pixel
            transcendentals=0,
            bytes_accessed=2 * N * C * HW * itemsize),
    )(v_col, u_col, x_flat)

    return out_flat.reshape(N, C, H, W), log_det_jac, z


if __name__ == "__main__":
    key = jax.random.PRNGKey(0)
    N, C, H, W = 2, 4, 16, 16

    # Parameters per Housholder1x1Conv.__init__: v = ones(channels)
    v = jnp.ones((C,), dtype=jnp.float32)

    kx, kz = jax.random.split(key)
    x = jax.random.normal(kx, (N, C, H, W), dtype=jnp.float32)
    log_det_jac = jnp.zeros((N,), dtype=jnp.float32)
    z = jax.random.normal(kz, (N, C, H, W), dtype=jnp.float32)

    y, ldj_out, z_out = householder_1x1_conv(x, v, log_det_jac, z)
    y = jax.block_until_ready(y)

    # Reference (plain JAX) check of the 1x1-conv semantics.
    w_ref = jnp.eye(C, dtype=jnp.float32) - 2.0 * jnp.outer(v, v) / jnp.dot(v, v)
    y_ref = jnp.einsum("oc,nchw->nohw", w_ref, x)
    assert np.allclose(np.asarray(y), np.asarray(y_ref), atol=1e-5, rtol=1e-5)
    assert np.allclose(np.asarray(ldj_out), np.asarray(log_det_jac))
    assert np.allclose(np.asarray(z_out), np.asarray(z))

    print("KERNEL_OK")
</pallas_src>

<mosaic_0001>
module attributes {stable_mosaic.version = 11 : i64} {
  func.func @householder_conv_kernel(%arg0: i32, %arg1: i32, %arg2: memref<4x1xf32, #tpu.memory_space<vmem>>, %arg3: memref<4x1xf32, #tpu.memory_space<vmem>>, %arg4: memref<1x4x256xf32, #tpu.memory_space<vmem>>, %arg5: memref<1x4x256xf32, #tpu.memory_space<vmem>>) attributes {dimension_semantics = [#tpu.dimension_semantics<parallel>, #tpu.dimension_semantics<parallel>], iteration_bounds = array<i64: 2, 1>, scalar_prefetch = 0 : i64, scratch_operands = 0 : i64, tpu.core_type = #tpu.core_type<tc>, window_params = [{pipeline_mode = #tpu.pipeline_mode<synchronous>, transform_indices = @transform_0, window_bounds = array<i64: 4, 1>}, {pipeline_mode = #tpu.pipeline_mode<synchronous>, transform_indices = @transform_1, window_bounds = array<i64: 4, 1>}, {transform_indices = @transform_2, window_bounds = array<i64: 1, 4, 256>}, {transform_indices = @transform_3, window_bounds = array<i64: 1, 4, 256>}]} {
    %c0 = arith.constant 0 : index
    %c0_0 = arith.constant 0 : index
    %c0_1 = arith.constant 0 : index
    %0 = vector.load %arg4[%c0, %c0_0, %c0_1] : memref<1x4x256xf32, #tpu.memory_space<vmem>>, vector<1x4x256xf32>
    %c0_2 = arith.constant 0 : index
    %c0_3 = arith.constant 0 : index
    %1 = vector.load %arg2[%c0_2, %c0_3] : memref<4x1xf32, #tpu.memory_space<vmem>>, vector<4x1xf32>
    %2 = vector.shape_cast %1 : vector<4x1xf32> to vector<1x4x1xf32>
    %3 = vector.broadcast %2 : vector<1x4x1xf32> to vector<1x4x256xf32>
    %4 = arith.mulf %3, %0 : vector<1x4x256xf32>
    %cst = arith.constant dense<0.000000e+00> : vector<1x256xf32>
    %5 = vector.multi_reduction <add>, %4, %cst [1] : vector<1x4x256xf32> to vector<1x256xf32>
    %6 = vector.shape_cast %5 : vector<1x256xf32> to vector<1x1x256xf32>
    %c0_4 = arith.constant 0 : index
    %c0_5 = arith.constant 0 : index
    %7 = vector.load %arg3[%c0_4, %c0_5] : memref<4x1xf32, #tpu.memory_space<vmem>>, vector<4x1xf32>
    %8 = vector.shape_cast %7 : vector<4x1xf32> to vector<1x4x1xf32>
    %9 = vector.broadcast %8 : vector<1x4x1xf32> to vector<1x4x256xf32>
    %10 = vector.broadcast %6 : vector<1x1x256xf32> to vector<1x4x256xf32>
    %11 = arith.mulf %9, %10 : vector<1x4x256xf32>
    %12 = arith.subf %0, %11 : vector<1x4x256xf32>
    %c0_6 = arith.constant 0 : index
    %c0_7 = arith.constant 0 : index
    %c0_8 = arith.constant 0 : index
    %13 = vector.load %arg5[%c0_6, %c0_7, %c0_8] : memref<1x4x256xf32, #tpu.memory_space<vmem>>, vector<1x4x256xf32>
    tpu.vector_store %arg5[%c0_6, %c0_7, %c0_8], %12 {strides = array<i32>} : memref<1x4x256xf32, #tpu.memory_space<vmem>>, vector<1x4x256xf32>,
    return
  }
  func.func @transform_0(%arg0: i32, %arg1: i32) -> (i32, i32) {
    %c0_i32 = arith.constant 0 : i32
    %c0_i32_0 = arith.constant 0 : i32
    %c0_i32_1 = arith.constant 0 : i32
    return %c0_i32, %c0_i32_0 : i32, i32
  }
  func.func @transform_1(%arg0: i32, %arg1: i32) -> (i32, i32) {
    %c0_i32 = arith.constant 0 : i32
    %c0_i32_0 = arith.constant 0 : i32
    %c0_i32_1 = arith.constant 0 : i32
    return %c0_i32, %c0_i32_0 : i32, i32
  }
  func.func @transform_2(%arg0: i32, %arg1: i32) -> (i32, i32, i32) {
    %c0_i32 = arith.constant 0 : i32
    %c0_i32_0 = arith.constant 0 : i32
    return %arg0, %c0_i32, %arg1 : i32, i32, i32
  }
  func.func @transform_3(%arg0: i32, %arg1: i32) -> (i32, i32, i32) {
    %c0_i32 = arith.constant 0 : i32
    %c0_i32_0 = arith.constant 0 : i32
    return %arg0, %c0_i32, %arg1 : i32, i32, i32
  }
}

</mosaic_0001>

<bundles_post_ra>
// kernel: tpu_custom_call.1
= control target key start
LH: loop header
LB: loop body
LE: loop exit
PB: predicated region body
PF: predicated region fallthrough
CT: control target
= control target key end

     0   :  { %8 = vsyncpa [#allocation3], 0  ;;  %s706_s0 = inlined_call_operand.vmem [shape: f32[4,1], index: 0, kind: input, shape index: {}]   ;;  %s707_s1 = inlined_call_operand.vmem [shape: f32[4,1], index: 1, kind: input, shape index: {}]   ;;  %s708_s2 = inlined_call_operand.hbm [shape: f32[2,4,256], index: 2, kind: input, shape index: {}]   ;;  %s709_s3 = inlined_call_operand.hbm [shape: f32[2,4,256], index: 3, kind: output, shape index: {}]  }
   0x1   :  { %10 = vsyncpa [#allocation3 + $0x1], 0 }
   0x2   :  { %11 = vsyncpa [#allocation4], 0 }
   0x3   :  { %13 = vsyncpa [#allocation4 + $0x1], 0  ;;  %s573_s12 = smov 0   ;;  %s575_s13 = smov 0  }
   0x4   :  { %s577_s14 = smov 0   ;;  %s579_s15 = smov 0  }
   0x5   :  { %s581_s16 = smov 0   ;;  %s583_s17 = smov 0  }
   0x6 LB: > { %s357_s18 = sadd.s32 4294967295, %s550_s17   ;;  %s358_s19 = sadd.s32 4294967294, %s550_s17   ;;  %s550_s17 = sphi %s583_s17, %s19_s17   ;;  %s546_s16 = sphi %s581_s16, %s718_s16   ;;  %s542_s15 = sphi %s579_s15, %s717_s15   ;;  %s538_s14 = sphi %s577_s14, %s716_s14   ;;  %s534_s13 = sphi %s575_s13, %s715_s13   ;;  %s530_s12 = sphi %s573_s12, %s714_s12  }
   0x7   : > { %s31_s20 = sadd.s32 1, %s546_s16  ;;  %s82_s21 = sadd.s32 1, %s538_s14 }
   0x8   : > { %p33_p0 = scmp.ge.s32.totalorder %s31_s20, 2  ;;  %p89_p1 = scmp.ne.s32.totalorder %s538_s14, %s534_s13 }
   0x9   : > { %p90_p2 = scmp.eq.s32.totalorder %s550_s17, 0  ;;  %p95_p3 = scmp.ne.s32.totalorder %s534_s13, %s530_s12 }
   0xa   : > { %s720_s20 = smov (%p33_p0, %s31_s20), 0  ;;  %p96_p5 = scmp.eq.s32.totalorder %s357_s18, 0 }
   0xb   : > { %p614_p4 = por %p90_p2, %p89_p1  ;;  %s77_s23 = ssub.s32 %s546_s16, %s720_s20 }
   0xc   : > { %p121_p6 = scmp.eq.s32.totalorder %s357_s18, 1  ;;  %p80_p7 = scmp.eq.s32.totalorder %s77_s23, 0 }
   0xd   : > { %p620_p8 = por %p96_p5, %p95_p3  ;;  %p127_p10 = scmp.eq.s32.totalorder %s358_s19, 1 }
   0xe   : > { %p624_p9 = por %p121_p6, %p89_p1  ;;  %p360_p12 = scmp.ge.s32.totalorder %s550_s17, 2 }
   0xf   : > { %s629_s26 = scalar_select %p80_p7, %s538_s14, %s82_s21  }
  0x10   : > { %p631_p11 = por %p127_p10, %p95_p3  ;;  %p386_p13 = scmp.lt.s32.totalorder %s550_s17, 2 }
  0x11   : > { %s153_s28 = sand.u32 1, %s538_s14   ;;  %s372_s30 = sshll.u32 %s546_s16, 3 }
  0x12   : > { %s361_s29 = sshll.u32 %s153_s28, 3  ;;  %s164_s6 = scalar_lea.hbm %s708_s2, %s372_s30 }
  0x13   : > { %s157_s7 = scalar_lea.vmem [#allocation2], %s361_s29  ;;  %s166_s9 = sshll.u32 %s164_s6, 4  ;;  %s167_s9 = int_to_ptr.hbm [resolvable:$true] %s166_s9 }
  0x14   : > { %s168_s8 = sshll.u32 %s157_s7, 4  ;;  %p379_p0 = pnand %p386_p13, %p614_p4  ;;  %s169_s8 = int_to_ptr.vmem [resolvable:$true] %s168_s8 }
  0x15   : > { %p364_p1 = scmp.ge.s32.totalorder %s550_s17, 1  ;;  %p173_p2 = scmp.lt.s32.totalorder %s550_s17, 3 }
  0x16   : > { %s154_s10 = scalar_lea.sflag [#allocation3], %s153_s28 }
  0x17   : > { %381 = dma.hbm_to_vmem [thread:$0]  (!%p379_p0), %s167_s9, 128, %s169_s8, %s154_s10  }
  0x18   : > { %p174_p3 = pnand %p364_p1, %p173_p2 }
  0x19   : > { %s647_s11 = sand.u32 (!%p174_p3), 1, %s534_s13  }
  0x1a   : > { %177 = sbr.rel (%p174_p3) target bundleno = 174 (0xae), region = 32  ;;  %s365_s18 = sshll.u32 (!%p174_p3), %s647_s11, 3 }
  0x1b   : > { %s180_s19 = scalar_lea.sflag (!%p174_p3), [#allocation3], %s647_s11  ;;  %s183_s21 = scalar_lea.vmem (!%p174_p3), [#allocation2], %s365_s18 }
  0x1f   : > { %521 = dma.done.wait (%p620_p8), %s180_s19, 128  }
  0x20   : > { %523 = vsyncadd (%p620_p8), %s180_s19, 4294967168  ;;  %v552_v0 = vmov 0   ;;  %v210_v1 = vld [vmem:[%s706_s0] sm:$0xf]  ;;  %v209_v3 = vld [vmem:[%s183_s21] sm:$0xff]  ;;  %vm224_vm0 = vcmask 1043456  }
  0x21   : > { %437 = vset.pattern.permute.xlu0 %v552_v0  ;;  %v239_v2 = vld [vmem:[%s707_s1] sm:$0xf]  ;;  %217 = vst [vmem:[#allocation1] ss:$2 sm:$0xff] %v209_v3  ;;  %s373_s24 = sshll.u32 %s542_s15, 3  ;;  %s206_s6 = scalar_lea.vmem [#allocation5], %s365_s18 }
  0x22   : > { %213 = vperm.xlu0 %437, %v210_v1   ;;  %s268_s5 = scalar_lea.hbm %s709_s3, %s373_s24  ;;  %s270_s7 = sshll.u32 %s206_s6, 4  ;;  %s271_s7 = int_to_ptr.vmem [resolvable:$true] %s270_s7 }
  0x23   : > { %s272_s8 = sshll.u32 %s268_s5, 4  ;;  %s255_s15 = scalar_lea.sflag [#allocation4], %s647_s11  ;;  %s273_s8 = int_to_ptr.hbm [resolvable:$true] %s272_s8 }
  0x24   : > { %s482_s9 = sshra.s32 %s273_s8, 4  ;;  %s488_s18 = scalar_lea.hbm %s709_s3, 16  ;;  %s483_s9 = int_to_ptr.hbm [resolvable:$true] %s482_s9 }
  0x25   : > { %s484_s10 = scalar_lea.hbm %s483_s9, 8  ;;  %p489_p7 = scmp.lt.s32.totalorder %s483_s9, %s709_s3 }
  0x26   : > { %p485_p4 = scmp.ne.s32.totalorder %s483_s9, %s484_s10  ;;  %p490_p8 = scmp.lt.s32.totalorder %s488_s18, %s484_s10 }
  0x28   : > { %v218_v4 = vld.sshfl [vmem:[#allocation1] sm:$0xff pattern:$0x75316420]  ;;  %v219_v5 = vld.sshfl [vmem:[#allocation1 + $0x8] sm:$0xff pattern:$0x75316420]  ;;  %p486_p5 = pnand %p485_p4, %p624_p9  ;;  %p491_p10 = por %p490_p8, %p489_p7 }
  0x2a   : > { %242 = vperm.xlu0 %437, %v239_v2   ;;  %p487_p6 = pneg %p486_p5 }
  0x2c   : > { %p492_p13 = pnand %p491_p10, %p487_p6 }
  0x94   : > { %v214_v6 = vpop.permute.xlu0 %213 }
  0x95   : > { %v222_v7 = vmul.f32 %v218_v4, %v214_v6  ;;  %v223_v8 = vmul.f32 %v219_v5, %v214_v6 }
  0x97   : > { %v225_v9 = vsel %vm224_vm0, %v222_v7, 0.0  ;;  %v232_v10 = vsel %vm224_vm0, %v223_v8, 0.0 }
  0x98   : > { %v226_v11 = vrot.slane %v225_v9, 4  ;;  %v233_v12 = vrot.slane %v232_v10, 4 }
  0x9a   : > { %v227_v13 = vadd.f32 %v226_v11, %v225_v9  ;;  %v234_v14 = vadd.f32 %v233_v12, %v232_v10 }
  0x9c   : > { %v228_v15 = vrot.slane %v227_v13, 2  ;;  %v235_v16 = vrot.slane %v234_v14, 2  ;;  %v243_v23 = vpop.permute.xlu0 %242 }
  0x9e   : > { %v229_v17 = vadd.f32 %v228_v15, %v227_v13  ;;  %v236_v18 = vadd.f32 %v235_v16, %v234_v14 }
  0xa0   : > { %v230_v19 = vrot.slane %v229_v17, 1  ;;  %v237_v20 = vrot.slane %v236_v18, 1 }
  0xa2   : > { %v231_v21 = vadd.f32 %v230_v19, %v229_v17  ;;  %v238_v22 = vadd.f32 %v237_v20, %v236_v18 }
  0xa4   : > { %v246_v24 = vmul.f32 %v243_v23, %v238_v22  ;;  %v245_v25 = vmul.f32 %v243_v23, %v231_v21 }
  0xa6   : > { %v249_v26 = vrot.slane %v246_v24, 4 }
  0xa8   : > { %v250_v27 = vsel %vm224_vm0, %v245_v25, %v249_v26 }
  0xa9   : > { %v252_v28 = vsub.f32 %v209_v3, %v250_v27 }
  0xab   : > { %253 = vst [vmem:[%s206_s6] sm:$0xff] %v252_v28 }
  0xac   : > { %495 = shalt.err (!%p492_p13)
}
  0xad   : > { %376 = dma.vmem_to_hbm [thread:$0]  (%p624_p9), %s271_s7, 128, %s273_s8, %s255_s15  }
  0xae PF: > { %s284_s11 = sand.u32 1, %s530_s12   ;;  %p383_p0 = pnand %p360_p12, %p631_p11 }
  0xaf   : > { %s285_s28 = scalar_lea.sflag [#allocation4], %s284_s11 }
  0xb0   : > { %p384_p1 = pneg %p383_p0 }
  0xb2   : > { %525 = dma.done.wait (%p384_p1), %s285_s28, 128  }
  0xb3   : > { %527 = vsyncadd (%p384_p1), %s285_s28, 4294967168  ;;  %s19_s17 = sadd.s32 1, %s550_s17   ;;  %s714_s12 = smov %s534_s13 }
  0xb4   : > { %p16_p2 = scmp.ge.s32.totalorder %s19_s17, 4   ;;  %s715_s13 = smov %s538_s14 }
  0xb5   : > { %s716_s14 = smov %s629_s26  ;;  %s717_s15 = smov %s546_s16 }
  0xb6   : > { %s718_s16 = smov %s720_s20  ;;  %18 = sbr.rel (!%p16_p2) target bundleno = 6 (0x6), region = 77 }
  0xbb   :  { %291 = vsyncpa [#allocation3], 1 }
  0xbc   :  { %293 = vsyncpa [#allocation3 + $0x1], 1 }
  0xbd   :  { %294 = vsyncpa [#allocation4], 1 }
  0xbe   :  { %296 = vsyncpa [#allocation4 + $0x1], 1 }

</bundles_post_ra>
